<compile_context>
chip_gen: v7x
topology: tpu7x:2x2x1
jax: 0.10.0
libtpu: 0.0.40
codegen_flags: <defaults>
</compile_context>

<pallas_src>
import functools

import jax
import jax.numpy as jnp
from jax.experimental import pallas as pl
from jax.experimental.pallas import tpu as pltpu


# ----------------------------------------------------------------------------
# Fused encoder kernel: all residual dilated-causal-conv blocks + mu/sigma heads
# ----------------------------------------------------------------------------
def _encoder_kernel(x_ref, *refs, layers, kernel_size, seq_len, compute_dtype):
    mu_ref, sigma_ref = refs[-2], refs[-1]
    w = refs[:-2]                              # flat list of weight/bias refs

    K = kernel_size
    T = seq_len
    Bb, _, Cin = x_ref.shape
    M = Bb * T

    # Fold batch into the matmul M dimension; channels stay on the lane axis.
    x = x_ref[...].reshape(M, Cin).astype(jnp.float32)

    # Per-row time index within its own sequence.  The causal mask both
    # zero-fills the (dilation*(K-1)) left padding and prevents rolled rows of
    # one batch element from leaking into the next one.
    t_local = jax.lax.broadcasted_iota(jnp.int32, (M, 1), 0) % T

    def shifted(z, s):
        # z_s[r] = z[r - s] within the same sequence, 0 in the causal pad region
        if s == 0:
            return z
        return jnp.where(t_local >= s, pltpu.roll(z, shift=s, axis=0), 0.0)

    def causal_conv(z, w_taps, b, dilation):
        # sum_k shift_{d*(K-1-k)}(z) @ w[k], accumulated in f32 on the MXU
        acc = None
        for k in range(K):                     # static, tiny K
            zk = shifted(z, dilation * (K - 1 - k))
            part = jnp.dot(zk.astype(compute_dtype),
                           w_taps[k].astype(compute_dtype),
                           preferred_element_type=jnp.float32)
            acc = part if acc is None else acc + part
        return acc + b[...]

    # --- residual blocks (statically unrolled; weights are VMEM-resident) ---
    idx = 0
    for cfg in layers:
        d = cfg["dilation"]
        w1, b1, w2, b2 = w[idx], w[idx + 1], w[idx + 2], w[idx + 3]
        idx += 4

        h = jnp.maximum(causal_conv(x, w1, b1, d), 0.0)        # conv1 + ReLU
        y = causal_conv(h, w2, b2, d)                          # conv2
        if cfg["relu_second"]:                                  # ReLU on non-final blocks
            y = jnp.maximum(y, 0.0)

        if cfg["use_proj"]:                                     # 1x1 residual projection
            w3, b3 = w[idx], w[idx + 1]
            idx += 2
            res = jnp.dot(x.astype(compute_dtype), w3[...].astype(compute_dtype),
                          preferred_element_type=jnp.float32) + b3[...]
        else:
            res = x
        x = y + res

    # --- mu / sigma heads, fused so the final activation never leaves VMEM ---
    mu_w, mu_b, sig_w, sig_b = w[idx], w[idx + 1], w[idx + 2], w[idx + 3]
    xc = x.astype(compute_dtype)
    mu = jnp.dot(xc, mu_w[...].astype(compute_dtype),
                 preferred_element_type=jnp.float32) + mu_b[...]
    sg = jnp.dot(xc, sig_w[...].astype(compute_dtype),
                 preferred_element_type=jnp.float32) + sig_b[...]

    Ldim = mu_ref.shape[2]
    # TODO(synk): outputs are only latent_dim lanes wide -> masked stores; pad
    # channels toward 128 if latent_dim is ever scaled up.
    mu_ref[...] = mu.reshape(Bb, T, Ldim).astype(mu_ref.dtype)
    sigma_ref[...] = jnp.maximum(sg, 0.0).reshape(Bb, T, Ldim).astype(sigma_ref.dtype)


# ----------------------------------------------------------------------------
# Wrapper: builds the (single) pallas_call for the whole encoder
# ----------------------------------------------------------------------------
def tcn_encoder_forward(params, target, cond, *, kernel_size, num_layers,
                        dilation_base=2, compute_dtype=jnp.float32):
    # mirror the module: cond is None / empty -> skip concat
    if cond is None or cond.size == 0:
        x = target
    else:
        x = jnp.concatenate([target, cond], axis=2)

    B, T, Cin = x.shape
    # Keep >= 2 grid steps when possible so both v7x TensorCores get work.
    nb = 2 if (B >= 2 and B % 2 == 0) else 1
    Bb = B // nb

    inputs = [x]
    in_specs = [pl.BlockSpec((Bb, T, Cin), lambda i: (i, 0, 0))]

    def add_weight(arr):
        inputs.append(arr)
        # constant index_map -> weight block stays resident across grid steps
        in_specs.append(pl.BlockSpec(arr.shape, lambda i, _nd=arr.ndim: (0,) * _nd))

    layers = []
    for i in range(num_layers):
        blk = params["blocks"][i]
        add_weight(blk["w1"])
        add_weight(blk["b1"])
        add_weight(blk["w2"])
        add_weight(blk["b2"])
        if blk["use_proj"]:                    # skip identity w3/b3 entirely
            add_weight(blk["w3"])
            add_weight(blk["b3"])
        layers.append(dict(dilation=dilation_base ** i,
                           use_proj=blk["use_proj"],
                           relu_second=(i < num_layers - 1)))

    for name in ("mu_w", "mu_b", "sigma_w", "sigma_b"):
        add_weight(params[name])
    Ldim = params["mu_w"].shape[1]

    kernel = functools.partial(
        _encoder_kernel, layers=layers, kernel_size=kernel_size, seq_len=T,
        compute_dtype=compute_dtype)

    out_spec = pl.BlockSpec((Bb, T, Ldim), lambda i: (i, 0, 0))
    mu, sigma = pl.pallas_call(
        kernel,
        out_shape=(jax.ShapeDtypeStruct((B, T, Ldim), x.dtype),
                   jax.ShapeDtypeStruct((B, T, Ldim), x.dtype)),
        grid_spec=pltpu.PrefetchScalarGridSpec(
            num_scalar_prefetch=0,
            grid=(nb,),
            in_specs=in_specs,
            out_specs=[out_spec, out_spec],
        ),
        compiler_params=pltpu.CompilerParams(
            dimension_semantics=("parallel",)),
    )(*inputs)
    return mu, sigma


# ----------------------------------------------------------------------------
# Parameter setup
# ----------------------------------------------------------------------------
def init_params(key, *, target_dim, condition_dim, kernel_size, hidden_dim,
                latent_dim, num_layers):
    input_size = target_dim + condition_dim
    params = {"blocks": []}
    for i in range(num_layers):
        in_dim = input_size if i == 0 else hidden_dim
        out_dim = hidden_dim                   # target_size == hidden_dim in the module
        key, k1, k2, k3, k4, k5, k6 = jax.random.split(key, 7)
        blk = {
            "w1": 0.3 * jax.random.normal(k1, (kernel_size, in_dim, hidden_dim),
                                          jnp.float32),
            "b1": 0.1 * jax.random.normal(k2, (1, hidden_dim), jnp.float32),
            "w2": 0.3 * jax.random.normal(k3, (kernel_size, hidden_dim, out_dim),
                                          jnp.float32),
            "b2": 0.1 * jax.random.normal(k4, (1, out_dim), jnp.float32),
            "use_proj": in_dim != out_dim,     # darts adds conv3 only on mismatch
        }
        if blk["use_proj"]:
            blk["w3"] = 0.3 * jax.random.normal(k5, (in_dim, out_dim), jnp.float32)
            blk["b3"] = 0.1 * jax.random.normal(k6, (1, out_dim), jnp.float32)
        params["blocks"].append(blk)
    key, k1, k2, k3, k4 = jax.random.split(key, 5)
    params["mu_w"] = 0.3 * jax.random.normal(k1, (hidden_dim, latent_dim), jnp.float32)
    params["mu_b"] = 0.1 * jax.random.normal(k2, (1, latent_dim), jnp.float32)
    params["sigma_w"] = 0.3 * jax.random.normal(k3, (hidden_dim, latent_dim), jnp.float32)
    params["sigma_b"] = 0.1 * jax.random.normal(k4, (1, latent_dim), jnp.float32)
    return params


# ----------------------------------------------------------------------------
# Pure-JAX reference for validation
# ----------------------------------------------------------------------------
def _ref_forward(params, target, cond, *, kernel_size, num_layers,
                 dilation_base=2):
    x = jnp.concatenate([target, cond], axis=2) if cond is not None else target
    T = x.shape[1]
    for i in range(num_layers):
        blk = params["blocks"][i]
        d = dilation_base ** i
        L = d * (kernel_size - 1)

        def causal_conv(z, w, b):
            zp = jnp.pad(z, ((0, 0), (L, 0), (0, 0)))
            acc = sum(jnp.einsum("btc,cf->btf", zp[:, k * d:k * d + T, :], w[k])
                      for k in range(kernel_size))
            return acc + b[None, :, :]

        h = jax.nn.relu(causal_conv(x, blk["w1"], blk["b1"]))
        y = causal_conv(h, blk["w2"], blk["b2"])
        if i < num_layers - 1:
            y = jax.nn.relu(y)
        if blk["use_proj"]:
            res = jnp.einsum("btc,cf->btf", x, blk["w3"]) + blk["b3"][None, :, :]
        else:
            res = x
        x = y + res
    mu = jnp.einsum("bth,hl->btl", x, params["mu_w"]) + params["mu_b"][None, :, :]
    sigma = jax.nn.relu(jnp.einsum("bth,hl->btl", x, params["sigma_w"])
                        + params["sigma_b"][None, :, :])
    return mu, sigma


if __name__ == "__main__":
    # module hyper-params (small, consistent with _TCNEncoder.__init__)
    B, T = 2, 16
    TARGET_DIM, COND_DIM = 3, 1
    KERNEL_SIZE, HIDDEN_DIM, LATENT_DIM, NUM_LAYERS = 3, 8, 4, 2

    key = jax.random.PRNGKey(0)
    key, kt, kc, kp = jax.random.split(key, 4)
    target = jax.random.normal(kt, (B, T, TARGET_DIM), jnp.float32)
    cond = jax.random.normal(kc, (B, T, COND_DIM), jnp.float32)

    params = init_params(kp, target_dim=TARGET_DIM, condition_dim=COND_DIM,
                         kernel_size=KERNEL_SIZE, hidden_dim=HIDDEN_DIM,
                         latent_dim=LATENT_DIM, num_layers=NUM_LAYERS)

    mu, sigma = tcn_encoder_forward(params, target, cond,
                                    kernel_size=KERNEL_SIZE,
                                    num_layers=NUM_LAYERS)
    jax.block_until_ready((mu, sigma))

    mu_ref, sigma_ref = _ref_forward(params, target, cond,
                                     kernel_size=KERNEL_SIZE,
                                     num_layers=NUM_LAYERS)

    assert mu.shape == (B, T, LATENT_DIM) and sigma.shape == (B, T, LATENT_DIM)
    assert jnp.allclose(mu, mu_ref, atol=1e-4, rtol=1e-4)
    assert jnp.allclose(sigma, sigma_ref, atol=1e-4, rtol=1e-4)
    print("KERNEL_OK")
</pallas_src>

<mosaic_0001>
module attributes {stable_mosaic.version = 11 : i64} {
  func.func @_encoder_kernel(%arg0: i32, %arg1: memref<1x16x4xf32, #tpu.memory_space<vmem>>, %arg2: memref<3x4x8xf32, #tpu.memory_space<vmem>>, %arg3: memref<1x8xf32, #tpu.memory_space<vmem>>, %arg4: memref<3x8x8xf32, #tpu.memory_space<vmem>>, %arg5: memref<1x8xf32, #tpu.memory_space<vmem>>, %arg6: memref<4x8xf32, #tpu.memory_space<vmem>>, %arg7: memref<1x8xf32, #tpu.memory_space<vmem>>, %arg8: memref<3x8x8xf32, #tpu.memory_space<vmem>>, %arg9: memref<1x8xf32, #tpu.memory_space<vmem>>, %arg10: memref<3x8x8xf32, #tpu.memory_space<vmem>>, %arg11: memref<1x8xf32, #tpu.memory_space<vmem>>, %arg12: memref<8x4xf32, #tpu.memory_space<vmem>>, %arg13: memref<1x4xf32, #tpu.memory_space<vmem>>, %arg14: memref<8x4xf32, #tpu.memory_space<vmem>>, %arg15: memref<1x4xf32, #tpu.memory_space<vmem>>, %arg16: memref<1x16x4xf32, #tpu.memory_space<vmem>>, %arg17: memref<1x16x4xf32, #tpu.memory_space<vmem>>) attributes {dimension_semantics = [#tpu.dimension_semantics<parallel>], iteration_bounds = array<i64: 2>, scalar_prefetch = 0 : i64, scratch_operands = 0 : i64, tpu.core_type = #tpu.core_type<tc>, window_params = [{transform_indices = @transform_0, window_bounds = array<i64: 1, 16, 4>}, {pipeline_mode = #tpu.pipeline_mode<synchronous>, transform_indices = @transform_1, window_bounds = array<i64: 3, 4, 8>}, {pipeline_mode = #tpu.pipeline_mode<synchronous>, transform_indices = @transform_2, window_bounds = array<i64: 1, 8>}, {pipeline_mode = #tpu.pipeline_mode<synchronous>, transform_indices = @transform_3, window_bounds = array<i64: 3, 8, 8>}, {pipeline_mode = #tpu.pipeline_mode<synchronous>, transform_indices = @transform_4, window_bounds = array<i64: 1, 8>}, {pipeline_mode = #tpu.pipeline_mode<synchronous>, transform_indices = @transform_5, window_bounds = array<i64: 4, 8>}, {pipeline_mode = #tpu.pipeline_mode<synchronous>, transform_indices = @transform_6, window_bounds = array<i64: 1, 8>}, {pipeline_mode = #tpu.pipeline_mode<synchronous>, transform_indices = @transform_7, window_bounds = array<i64: 3, 8, 8>}, {pipeline_mode = #tpu.pipeline_mode<synchronous>, transform_indices = @transform_8, window_bounds = array<i64: 1, 8>}, {pipeline_mode = #tpu.pipeline_mode<synchronous>, transform_indices = @transform_9, window_bounds = array<i64: 3, 8, 8>}, {pipeline_mode = #tpu.pipeline_mode<synchronous>, transform_indices = @transform_10, window_bounds = array<i64: 1, 8>}, {pipeline_mode = #tpu.pipeline_mode<synchronous>, transform_indices = @transform_11, window_bounds = array<i64: 8, 4>}, {pipeline_mode = #tpu.pipeline_mode<synchronous>, transform_indices = @transform_12, window_bounds = array<i64: 1, 4>}, {pipeline_mode = #tpu.pipeline_mode<synchronous>, transform_indices = @transform_13, window_bounds = array<i64: 8, 4>}, {pipeline_mode = #tpu.pipeline_mode<synchronous>, transform_indices = @transform_14, window_bounds = array<i64: 1, 4>}, {transform_indices = @transform_15, window_bounds = array<i64: 1, 16, 4>}, {transform_indices = @transform_16, window_bounds = array<i64: 1, 16, 4>}]} {
    %c0 = arith.constant 0 : index
    %c0_0 = arith.constant 0 : index
    %c0_1 = arith.constant 0 : index
    %0 = vector.load %arg1[%c0, %c0_0, %c0_1] : memref<1x16x4xf32, #tpu.memory_space<vmem>>, vector<1x16x4xf32>
    %1 = vector.shape_cast %0 : vector<1x16x4xf32> to vector<16x4xf32>
    %2 = tpu.iota {dimensions = array<i32: 0>} : vector<16x1xi32>
    %c16_i32 = arith.constant 16 : i32
    %c0_i32 = arith.constant 0 : i32
    %3 = arith.cmpi eq, %c16_i32, %c0_i32 : i32
    %c1_i32 = arith.constant 1 : i32
    %4 = arith.select %3, %c1_i32, %c16_i32 : i32
    %5 = vector.broadcast %4 : i32 to vector<16x1xi32>
    %6 = arith.remsi %2, %5 : vector<16x1xi32>
    %c0_i32_2 = arith.constant 0 : i32
    %7 = vector.broadcast %c0_i32_2 : i32 to vector<16x1xi32>
    %8 = arith.cmpi ne, %6, %7 : vector<16x1xi32>
    %c0_i32_3 = arith.constant 0 : i32
    %9 = vector.broadcast %c0_i32_3 : i32 to vector<16x1xi32>
    %10 = arith.cmpi slt, %6, %9 : vector<16x1xi32>
    %c0_i32_4 = arith.constant 0 : i32
    %11 = arith.cmpi slt, %4, %c0_i32_4 : i32
    %12 = vector.broadcast %11 : i1 to vector<16x1xi1>
    %13 = vector.broadcast %12 : vector<16x1xi1> to vector<16x1xi1>
    %14 = arith.xori %10, %13 : vector<16x1xi1>
    %15 = arith.andi %14, %8 : vector<16x1xi1>
    %16 = vector.broadcast %4 : i32 to vector<16x1xi32>
    %17 = arith.addi %6, %16 : vector<16x1xi32>
    %18 = arith.select %15, %17, %6 : vector<16x1xi1>, vector<16x1xi32>
    %c2_i32 = arith.constant 2 : i32
    %19 = vector.broadcast %c2_i32 : i32 to vector<16x1xi32>
    %20 = arith.cmpi sge, %18, %19 : vector<16x1xi32>
    %c2_i32_5 = arith.constant 2 : i32
    %21 = tpu.dynamic_rotate %1 by %c2_i32_5 dim 0 : vector<16x4xf32>, i32 -> vector<16x4xf32>
    %cst = arith.constant 0.000000e+00 : f32
    %22 = vector.shape_cast %20 : vector<16x1xi1> to vector<16x1xi1>
    %23 = vector.broadcast %22 : vector<16x1xi1> to vector<16x4xi1>
    %24 = vector.broadcast %cst : f32 to vector<16x4xf32>
    %25 = arith.select %23, %21, %24 : vector<16x4xi1>, vector<16x4xf32>
    %c0_6 = arith.constant 0 : index
    %c0_7 = arith.constant 0 : index
    %c0_8 = arith.constant 0 : index
    %26 = vector.load %arg2[%c0_6, %c0_7, %c0_8] : memref<3x4x8xf32, #tpu.memory_space<vmem>>, vector<1x4x8xf32>
    %27 = vector.shape_cast %26 : vector<1x4x8xf32> to vector<4x8xf32>
    %cst_9 = arith.constant dense<0.000000e+00> : vector<16x8xf32>
    %28 = tpu.matmul %25, %27, %cst_9 {dimension_numbers = #tpu.dot_dimension_numbers<[1], [0], [0], [1], [0, 0, 1, 1], [], []>} : vector<16x4xf32>, vector<4x8xf32>, vector<16x8xf32> -> vector<16x8xf32>
    %c1_i32_10 = arith.constant 1 : i32
    %29 = vector.broadcast %c1_i32_10 : i32 to vector<16x1xi32>
    %30 = arith.cmpi sge, %18, %29 : vector<16x1xi32>
    %c1_i32_11 = arith.constant 1 : i32
    %31 = tpu.dynamic_rotate %1 by %c1_i32_11 dim 0 : vector<16x4xf32>, i32 -> vector<16x4xf32>
    %cst_12 = arith.constant 0.000000e+00 : f32
    %32 = vector.shape_cast %30 : vector<16x1xi1> to vector<16x1xi1>
    %33 = vector.broadcast %32 : vector<16x1xi1> to vector<16x4xi1>
    %34 = vector.broadcast %cst_12 : f32 to vector<16x4xf32>
    %35 = arith.select %33, %31, %34 : vector<16x4xi1>, vector<16x4xf32>
    %c1 = arith.constant 1 : index
    %c0_13 = arith.constant 0 : index
    %c0_14 = arith.constant 0 : index
    %36 = vector.load %arg2[%c1, %c0_13, %c0_14] : memref<3x4x8xf32, #tpu.memory_space<vmem>>, vector<1x4x8xf32>
    %37 = vector.shape_cast %36 : vector<1x4x8xf32> to vector<4x8xf32>
    %cst_15 = arith.constant dense<0.000000e+00> : vector<16x8xf32>
    %38 = tpu.matmul %35, %37, %cst_15 {dimension_numbers = #tpu.dot_dimension_numbers<[1], [0], [0], [1], [0, 0, 1, 1], [], []>} : vector<16x4xf32>, vector<4x8xf32>, vector<16x8xf32> -> vector<16x8xf32>
    %39 = arith.addf %28, %38 : vector<16x8xf32>
    %c2 = arith.constant 2 : index
    %c0_16 = arith.constant 0 : index
    %c0_17 = arith.constant 0 : index
    %40 = vector.load %arg2[%c2, %c0_16, %c0_17] : memref<3x4x8xf32, #tpu.memory_space<vmem>>, vector<1x4x8xf32>
    %41 = vector.shape_cast %40 : vector<1x4x8xf32> to vector<4x8xf32>
    %cst_18 = arith.constant dense<0.000000e+00> : vector<16x8xf32>
    %42 = tpu.matmul %1, %41, %cst_18 {dimension_numbers = #tpu.dot_dimension_numbers<[1], [0], [0], [1], [0, 0, 1, 1], [], []>} : vector<16x4xf32>, vector<4x8xf32>, vector<16x8xf32> -> vector<16x8xf32>
    %43 = arith.addf %39, %42 : vector<16x8xf32>
    %c0_19 = arith.constant 0 : index
    %c0_20 = arith.constant 0 : index
    %44 = vector.load %arg3[%c0_19, %c0_20] : memref<1x8xf32, #tpu.memory_space<vmem>>, vector<1x8xf32>
    %45 = vector.broadcast %44 : vector<1x8xf32> to vector<16x8xf32>
    %46 = arith.addf %43, %45 : vector<16x8xf32>
    %cst_21 = arith.constant 0.000000e+00 : f32
    %47 = vector.broadcast %cst_21 : f32 to vector<16x8xf32>
    %48 = arith.maximumf %46, %47 : vector<16x8xf32>
    %c2_i32_22 = arith.constant 2 : i32
    %49 = vector.broadcast %c2_i32_22 : i32 to vector<16x1xi32>
    %50 = arith.cmpi sge, %18, %49 : vector<16x1xi32>
    %c2_i32_23 = arith.constant 2 : i32
    %51 = tpu.dynamic_rotate %48 by %c2_i32_23 dim 0 : vector<16x8xf32>, i32 -> vector<16x8xf32>
    %cst_24 = arith.constant 0.000000e+00 : f32
    %52 = vector.shape_cast %50 : vector<16x1xi1> to vector<16x1xi1>
    %53 = vector.broadcast %52 : vector<16x1xi1> to vector<16x8xi1>
    %54 = vector.broadcast %cst_24 : f32 to vector<16x8xf32>
    %55 = arith.select %53, %51, %54 : vector<16x8xi1>, vector<16x8xf32>
    %c0_25 = arith.constant 0 : index
    %c0_26 = arith.constant 0 : index
    %c0_27 = arith.constant 0 : index
    %56 = vector.load %arg4[%c0_25, %c0_26, %c0_27] : memref<3x8x8xf32, #tpu.memory_space<vmem>>, vector<1x8x8xf32>
    %57 = vector.shape_cast %56 : vector<1x8x8xf32> to vector<8x8xf32>
    %cst_28 = arith.constant dense<0.000000e+00> : vector<16x8xf32>
    %58 = tpu.matmul %55, %57, %cst_28 {dimension_numbers = #tpu.dot_dimension_numbers<[1], [0], [0], [1], [0, 0, 1, 1], [], []>} : vector<16x8xf32>, vector<8x8xf32>, vector<16x8xf32> -> vector<16x8xf32>
    %c1_i32_29 = arith.constant 1 : i32
    %59 = vector.broadcast %c1_i32_29 : i32 to vector<16x1xi32>
    %60 = arith.cmpi sge, %18, %59 : vector<16x1xi32>
    %c1_i32_30 = arith.constant 1 : i32
    %61 = tpu.dynamic_rotate %48 by %c1_i32_30 dim 0 : vector<16x8xf32>, i32 -> vector<16x8xf32>
    %cst_31 = arith.constant 0.000000e+00 : f32
    %62 = vector.shape_cast %60 : vector<16x1xi1> to vector<16x1xi1>
    %63 = vector.broadcast %62 : vector<16x1xi1> to vector<16x8xi1>
    %64 = vector.broadcast %cst_31 : f32 to vector<16x8xf32>
    %65 = arith.select %63, %61, %64 : vector<16x8xi1>, vector<16x8xf32>
    %c1_32 = arith.constant 1 : index
    %c0_33 = arith.constant 0 : index
    %c0_34 = arith.constant 0 : index
    %66 = vector.load %arg4[%c1_32, %c0_33, %c0_34] : memref<3x8x8xf32, #tpu.memory_space<vmem>>, vector<1x8x8xf32>
    %67 = vector.shape_cast %66 : vector<1x8x8xf32> to vector<8x8xf32>
    %cst_35 = arith.constant dense<0.000000e+00> : vector<16x8xf32>
    %68 = tpu.matmul %65, %67, %cst_35 {dimension_numbers = #tpu.dot_dimension_numbers<[1], [0], [0], [1], [0, 0, 1, 1], [], []>} : vector<16x8xf32>, vector<8x8xf32>, vector<16x8xf32> -> vector<16x8xf32>
    %69 = arith.addf %58, %68 : vector<16x8xf32>
    %c2_36 = arith.constant 2 : index
    %c0_37 = arith.constant 0 : index
    %c0_38 = arith.constant 0 : index
    %70 = vector.load %arg4[%c2_36, %c0_37, %c0_38] : memref<3x8x8xf32, #tpu.memory_space<vmem>>, vector<1x8x8xf32>
    %71 = vector.shape_cast %70 : vector<1x8x8xf32> to vector<8x8xf32>
    %cst_39 = arith.constant dense<0.000000e+00> : vector<16x8xf32>
    %72 = tpu.matmul %48, %71, %cst_39 {dimension_numbers = #tpu.dot_dimension_numbers<[1], [0], [0], [1], [0, 0, 1, 1], [], []>} : vector<16x8xf32>, vector<8x8xf32>, vector<16x8xf32> -> vector<16x8xf32>
    %73 = arith.addf %69, %72 : vector<16x8xf32>
    %c0_40 = arith.constant 0 : index
    %c0_41 = arith.constant 0 : index
    %74 = vector.load %arg5[%c0_40, %c0_41] : memref<1x8xf32, #tpu.memory_space<vmem>>, vector<1x8xf32>
    %75 = vector.broadcast %74 : vector<1x8xf32> to vector<16x8xf32>
    %76 = arith.addf %73, %75 : vector<16x8xf32>
    %cst_42 = arith.constant 0.000000e+00 : f32
    %77 = vector.broadcast %cst_42 : f32 to vector<16x8xf32>
    %78 = arith.maximumf %76, %77 : vector<16x8xf32>
    %c0_43 = arith.constant 0 : index
    %c0_44 = arith.constant 0 : index
    %79 = vector.load %arg6[%c0_43, %c0_44] : memref<4x8xf32, #tpu.memory_space<vmem>>, vector<4x8xf32>
    %cst_45 = arith.constant dense<0.000000e+00> : vector<16x8xf32>
    %80 = tpu.matmul %1, %79, %cst_45 {dimension_numbers = #tpu.dot_dimension_numbers<[1], [0], [0], [1], [0, 0, 1, 1], [], []>} : vector<16x4xf32>, vector<4x8xf32>, vector<16x8xf32> -> vector<16x8xf32>
    %c0_46 = arith.constant 0 : index
    %c0_47 = arith.constant 0 : index
    %81 = vector.load %arg7[%c0_46, %c0_47] : memref<1x8xf32, #tpu.memory_space<vmem>>, vector<1x8xf32>
    %82 = vector.broadcast %81 : vector<1x8xf32> to vector<16x8xf32>
    %83 = arith.addf %80, %82 : vector<16x8xf32>
    %84 = arith.addf %78, %83 : vector<16x8xf32>
    %c4_i32 = arith.constant 4 : i32
    %85 = vector.broadcast %c4_i32 : i32 to vector<16x1xi32>
    %86 = arith.cmpi sge, %18, %85 : vector<16x1xi32>
    %c4_i32_48 = arith.constant 4 : i32
    %87 = tpu.dynamic_rotate %84 by %c4_i32_48 dim 0 : vector<16x8xf32>, i32 -> vector<16x8xf32>
    %cst_49 = arith.constant 0.000000e+00 : f32
    %88 = vector.shape_cast %86 : vector<16x1xi1> to vector<16x1xi1>
    %89 = vector.broadcast %88 : vector<16x1xi1> to vector<16x8xi1>
    %90 = vector.broadcast %cst_49 : f32 to vector<16x8xf32>
    %91 = arith.select %89, %87, %90 : vector<16x8xi1>, vector<16x8xf32>
    %c0_50 = arith.constant 0 : index
    %c0_51 = arith.constant 0 : index
    %c0_52 = arith.constant 0 : index
    %92 = vector.load %arg8[%c0_50, %c0_51, %c0_52] : memref<3x8x8xf32, #tpu.memory_space<vmem>>, vector<1x8x8xf32>
    %93 = vector.shape_cast %92 : vector<1x8x8xf32> to vector<8x8xf32>
    %cst_53 = arith.constant dense<0.000000e+00> : vector<16x8xf32>
    %94 = tpu.matmul %91, %93, %cst_53 {dimension_numbers = #tpu.dot_dimension_numbers<[1], [0], [0], [1], [0, 0, 1, 1], [], []>} : vector<16x8xf32>, vector<8x8xf32>, vector<16x8xf32> -> vector<16x8xf32>
    %c2_i32_54 = arith.constant 2 : i32
    %95 = vector.broadcast %c2_i32_54 : i32 to vector<16x1xi32>
    %96 = arith.cmpi sge, %18, %95 : vector<16x1xi32>
    %c2_i32_55 = arith.constant 2 : i32
    %97 = tpu.dynamic_rotate %84 by %c2_i32_55 dim 0 : vector<16x8xf32>, i32 -> vector<16x8xf32>
    %cst_56 = arith.constant 0.000000e+00 : f32
    %98 = vector.shape_cast %96 : vector<16x1xi1> to vector<16x1xi1>
    %99 = vector.broadcast %98 : vector<16x1xi1> to vector<16x8xi1>
    %100 = vector.broadcast %cst_56 : f32 to vector<16x8xf32>
    %101 = arith.select %99, %97, %100 : vector<16x8xi1>, vector<16x8xf32>
    %c1_57 = arith.constant 1 : index
    %c0_58 = arith.constant 0 : index
    %c0_59 = arith.constant 0 : index
    %102 = vector.load %arg8[%c1_57, %c0_58, %c0_59] : memref<3x8x8xf32, #tpu.memory_space<vmem>>, vector<1x8x8xf32>
    %103 = vector.shape_cast %102 : vector<1x8x8xf32> to vector<8x8xf32>
    %cst_60 = arith.constant dense<0.000000e+00> : vector<16x8xf32>
    %104 = tpu.matmul %101, %103, %cst_60 {dimension_numbers = #tpu.dot_dimension_numbers<[1], [0], [0], [1], [0, 0, 1, 1], [], []>} : vector<16x8xf32>, vector<8x8xf32>, vector<16x8xf32> -> vector<16x8xf32>
    %105 = arith.addf %94, %104 : vector<16x8xf32>
    %c2_61 = arith.constant 2 : index
    %c0_62 = arith.constant 0 : index
    %c0_63 = arith.constant 0 : index
    %106 = vector.load %arg8[%c2_61, %c0_62, %c0_63] : memref<3x8x8xf32, #tpu.memory_space<vmem>>, vector<1x8x8xf32>
    %107 = vector.shape_cast %106 : vector<1x8x8xf32> to vector<8x8xf32>
    %cst_64 = arith.constant dense<0.000000e+00> : vector<16x8xf32>
    %108 = tpu.matmul %84, %107, %cst_64 {dimension_numbers = #tpu.dot_dimension_numbers<[1], [0], [0], [1], [0, 0, 1, 1], [], []>} : vector<16x8xf32>, vector<8x8xf32>, vector<16x8xf32> -> vector<16x8xf32>
    %109 = arith.addf %105, %108 : vector<16x8xf32>
    %c0_65 = arith.constant 0 : index
    %c0_66 = arith.constant 0 : index
    %110 = vector.load %arg9[%c0_65, %c0_66] : memref<1x8xf32, #tpu.memory_space<vmem>>, vector<1x8xf32>
    %111 = vector.broadcast %110 : vector<1x8xf32> to vector<16x8xf32>
    %112 = arith.addf %109, %111 : vector<16x8xf32>
    %cst_67 = arith.constant 0.000000e+00 : f32
    %113 = vector.broadcast %cst_67 : f32 to vector<16x8xf32>
    %114 = arith.maximumf %112, %113 : vector<16x8xf32>
    %c4_i32_68 = arith.constant 4 : i32
    %115 = vector.broadcast %c4_i32_68 : i32 to vector<16x1xi32>
    %116 = arith.cmpi sge, %18, %115 : vector<16x1xi32>
    %c4_i32_69 = arith.constant 4 : i32
    %117 = tpu.dynamic_rotate %114 by %c4_i32_69 dim 0 : vector<16x8xf32>, i32 -> vector<16x8xf32>
    %cst_70 = arith.constant 0.000000e+00 : f32
    %118 = vector.shape_cast %116 : vector<16x1xi1> to vector<16x1xi1>
    %119 = vector.broadcast %118 : vector<16x1xi1> to vector<16x8xi1>
    %120 = vector.broadcast %cst_70 : f32 to vector<16x8xf32>
    %121 = arith.select %119, %117, %120 : vector<16x8xi1>, vector<16x8xf32>
    %c0_71 = arith.constant 0 : index
    %c0_72 = arith.constant 0 : index
    %c0_73 = arith.constant 0 : index
    %122 = vector.load %arg10[%c0_71, %c0_72, %c0_73] : memref<3x8x8xf32, #tpu.memory_space<vmem>>, vector<1x8x8xf32>
    %123 = vector.shape_cast %122 : vector<1x8x8xf32> to vector<8x8xf32>
    %cst_74 = arith.constant dense<0.000000e+00> : vector<16x8xf32>
    %124 = tpu.matmul %121, %123, %cst_74 {dimension_numbers = #tpu.dot_dimension_numbers<[1], [0], [0], [1], [0, 0, 1, 1], [], []>} : vector<16x8xf32>, vector<8x8xf32>, vector<16x8xf32> -> vector<16x8xf32>
    %c2_i32_75 = arith.constant 2 : i32
    %125 = vector.broadcast %c2_i32_75 : i32 to vector<16x1xi32>
    %126 = arith.cmpi sge, %18, %125 : vector<16x1xi32>
    %c2_i32_76 = arith.constant 2 : i32
    %127 = tpu.dynamic_rotate %114 by %c2_i32_76 dim 0 : vector<16x8xf32>, i32 -> vector<16x8xf32>
    %cst_77 = arith.constant 0.000000e+00 : f32
    %128 = vector.shape_cast %126 : vector<16x1xi1> to vector<16x1xi1>
    %129 = vector.broadcast %128 : vector<16x1xi1> to vector<16x8xi1>
    %130 = vector.broadcast %cst_77 : f32 to vector<16x8xf32>
    %131 = arith.select %129, %127, %130 : vector<16x8xi1>, vector<16x8xf32>
    %c1_78 = arith.constant 1 : index
    %c0_79 = arith.constant 0 : index
    %c0_80 = arith.constant 0 : index
    %132 = vector.load %arg10[%c1_78, %c0_79, %c0_80] : memref<3x8x8xf32, #tpu.memory_space<vmem>>, vector<1x8x8xf32>
    %133 = vector.shape_cast %132 : vector<1x8x8xf32> to vector<8x8xf32>
    %cst_81 = arith.constant dense<0.000000e+00> : vector<16x8xf32>
    %134 = tpu.matmul %131, %133, %cst_81 {dimension_numbers = #tpu.dot_dimension_numbers<[1], [0], [0], [1], [0, 0, 1, 1], [], []>} : vector<16x8xf32>, vector<8x8xf32>, vector<16x8xf32> -> vector<16x8xf32>
    %135 = arith.addf %124, %134 : vector<16x8xf32>
    %c2_82 = arith.constant 2 : index
    %c0_83 = arith.constant 0 : index
    %c0_84 = arith.constant 0 : index
    %136 = vector.load %arg10[%c2_82, %c0_83, %c0_84] : memref<3x8x8xf32, #tpu.memory_space<vmem>>, vector<1x8x8xf32>
    %137 = vector.shape_cast %136 : vector<1x8x8xf32> to vector<8x8xf32>
    %cst_85 = arith.constant dense<0.000000e+00> : vector<16x8xf32>
    %138 = tpu.matmul %114, %137, %cst_85 {dimension_numbers = #tpu.dot_dimension_numbers<[1], [0], [0], [1], [0, 0, 1, 1], [], []>} : vector<16x8xf32>, vector<8x8xf32>, vector<16x8xf32> -> vector<16x8xf32>
    %139 = arith.addf %135, %138 : vector<16x8xf32>
    %c0_86 = arith.constant 0 : index
    %c0_87 = arith.constant 0 : index
    %140 = vector.load %arg11[%c0_86, %c0_87] : memref<1x8xf32, #tpu.memory_space<vmem>>, vector<1x8xf32>
    %141 = vector.broadcast %140 : vector<1x8xf32> to vector<16x8xf32>
    %142 = arith.addf %139, %141 : vector<16x8xf32>
    %143 = arith.addf %142, %84 : vector<16x8xf32>
    %c0_88 = arith.constant 0 : index
    %c0_89 = arith.constant 0 : index
    %144 = vector.load %arg12[%c0_88, %c0_89] : memref<8x4xf32, #tpu.memory_space<vmem>>, vector<8x4xf32>
    %cst_90 = arith.constant dense<0.000000e+00> : vector<16x4xf32>
    %145 = tpu.matmul %143, %144, %cst_90 {dimension_numbers = #tpu.dot_dimension_numbers<[1], [0], [0], [1], [0, 0, 1, 1], [], []>} : vector<16x8xf32>, vector<8x4xf32>, vector<16x4xf32> -> vector<16x4xf32>
    %c0_91 = arith.constant 0 : index
    %c0_92 = arith.constant 0 : index
    %146 = vector.load %arg13[%c0_91, %c0_92] : memref<1x4xf32, #tpu.memory_space<vmem>>, vector<1x4xf32>
    %147 = vector.broadcast %146 : vector<1x4xf32> to vector<16x4xf32>
    %148 = arith.addf %145, %147 : vector<16x4xf32>
    %c0_93 = arith.constant 0 : index
    %c0_94 = arith.constant 0 : index
    %149 = vector.load %arg14[%c0_93, %c0_94] : memref<8x4xf32, #tpu.memory_space<vmem>>, vector<8x4xf32>
    %cst_95 = arith.constant dense<0.000000e+00> : vector<16x4xf32>
    %150 = tpu.matmul %143, %149, %cst_95 {dimension_numbers = #tpu.dot_dimension_numbers<[1], [0], [0], [1], [0, 0, 1, 1], [], []>} : vector<16x8xf32>, vector<8x4xf32>, vector<16x4xf32> -> vector<16x4xf32>
    %c0_96 = arith.constant 0 : index
    %c0_97 = arith.constant 0 : index
    %151 = vector.load %arg15[%c0_96, %c0_97] : memref<1x4xf32, #tpu.memory_space<vmem>>, vector<1x4xf32>
    %152 = vector.broadcast %151 : vector<1x4xf32> to vector<16x4xf32>
    %153 = arith.addf %150, %152 : vector<16x4xf32>
    %154 = vector.shape_cast %148 : vector<16x4xf32> to vector<1x16x4xf32>
    %c0_98 = arith.constant 0 : index
    %c0_99 = arith.constant 0 : index
    %c0_100 = arith.constant 0 : index
    %155 = vector.load %arg16[%c0_98, %c0_99, %c0_100] : memref<1x16x4xf32, #tpu.memory_space<vmem>>, vector<1x16x4xf32>
    tpu.vector_store %arg16[%c0_98, %c0_99, %c0_100], %154 {strides = array<i32>} : memref<1x16x4xf32, #tpu.memory_space<vmem>>, vector<1x16x4xf32>,
    %cst_101 = arith.constant 0.000000e+00 : f32
    %156 = vector.broadcast %cst_101 : f32 to vector<16x4xf32>
    %157 = arith.maximumf %153, %156 : vector<16x4xf32>
    %158 = vector.shape_cast %157 : vector<16x4xf32> to vector<1x16x4xf32>
    %c0_102 = arith.constant 0 : index
    %c0_103 = arith.constant 0 : index
    %c0_104 = arith.constant 0 : index
    %159 = vector.load %arg17[%c0_102, %c0_103, %c0_104] : memref<1x16x4xf32, #tpu.memory_space<vmem>>, vector<1x16x4xf32>
    tpu.vector_store %arg17[%c0_102, %c0_103, %c0_104], %158 {strides = array<i32>} : memref<1x16x4xf32, #tpu.memory_space<vmem>>, vector<1x16x4xf32>,
    return
  }
  func.func @transform_0(%arg0: i32) -> (i32, i32, i32) {
    %c0_i32 = arith.constant 0 : i32
    %c0_i32_0 = arith.constant 0 : i32
    %c0_i32_1 = arith.constant 0 : i32
    return %arg0, %c0_i32, %c0_i32_0 : i32, i32, i32
  }
  func.func @transform_1(%arg0: i32) -> (i32, i32, i32) {
    %c0_i32 = arith.constant 0 : i32
    %c0_i32_0 = arith.constant 0 : i32
    %c0_i32_1 = arith.constant 0 : i32
    %c0_i32_2 = arith.constant 0 : i32
    return %c0_i32, %c0_i32_0, %c0_i32_1 : i32, i32, i32
  }
  func.func @transform_2(%arg0: i32) -> (i32, i32) {
    %c0_i32 = arith.constant 0 : i32
    %c0_i32_0 = arith.constant 0 : i32
    %c0_i32_1 = arith.constant 0 : i32
    return %c0_i32, %c0_i32_0 : i32, i32
  }
  func.func @transform_3(%arg0: i32) -> (i32, i32, i32) {
    %c0_i32 = arith.constant 0 : i32
    %c0_i32_0 = arith.constant 0 : i32
    %c0_i32_1 = arith.constant 0 : i32
    %c0_i32_2 = arith.constant 0 : i32
    return %c0_i32, %c0_i32_0, %c0_i32_1 : i32, i32, i32
  }
  func.func @transform_4(%arg0: i32) -> (i32, i32) {
    %c0_i32 = arith.constant 0 : i32
    %c0_i32_0 = arith.constant 0 : i32
    %c0_i32_1 = arith.constant 0 : i32
    return %c0_i32, %c0_i32_0 : i32, i32
  }
  func.func @transform_5(%arg0: i32) -> (i32, i32) {
    %c0_i32 = arith.constant 0 : i32
    %c0_i32_0 = arith.constant 0 : i32
    %c0_i32_1 = arith.constant 0 : i32
    return %c0_i32, %c0_i32_0 : i32, i32
  }
  func.func @transform_6(%arg0: i32) -> (i32, i32) {
    %c0_i32 = arith.constant 0 : i32
    %c0_i32_0 = arith.constant 0 : i32
    %c0_i32_1 = arith.constant 0 : i32
    return %c0_i32, %c0_i32_0 : i32, i32
  }
  func.func @transform_7(%arg0: i32) -> (i32, i32, i32) {
    %c0_i32 = arith.constant 0 : i32
    %c0_i32_0 = arith.constant 0 : i32
    %c0_i32_1 = arith.constant 0 : i32
    %c0_i32_2 = arith.constant 0 : i32
    return %c0_i32, %c0_i32_0, %c0_i32_1 : i32, i32, i32
  }
  func.func @transform_8(%arg0: i32) -> (i32, i32) {
    %c0_i32 = arith.constant 0 : i32
    %c0_i32_0 = arith.constant 0 : i32
    %c0_i32_1 = arith.constant 0 : i32
    return %c0_i32, %c0_i32_0 : i32, i32
  }
  func.func @transform_9(%arg0: i32) -> (i32, i32, i32) {
    %c0_i32 = arith.constant 0 : i32
    %c0_i32_0 = arith.constant 0 : i32
    %c0_i32_1 = arith.constant 0 : i32
    %c0_i32_2 = arith.constant 0 : i32
    return %c0_i32, %c0_i32_0, %c0_i32_1 : i32, i32, i32
  }
  func.func @transform_10(%arg0: i32) -> (i32, i32) {
    %c0_i32 = arith.constant 0 : i32
    %c0_i32_0 = arith.constant 0 : i32
    %c0_i32_1 = arith.constant 0 : i32
    return %c0_i32, %c0_i32_0 : i32, i32
  }
  func.func @transform_11(%arg0: i32) -> (i32, i32) {
    %c0_i32 = arith.constant 0 : i32
    %c0_i32_0 = arith.constant 0 : i32
    %c0_i32_1 = arith.constant 0 : i32
    return %c0_i32, %c0_i32_0 : i32, i32
  }
  func.func @transform_12(%arg0: i32) -> (i32, i32) {
    %c0_i32 = arith.constant 0 : i32
    %c0_i32_0 = arith.constant 0 : i32
    %c0_i32_1 = arith.constant 0 : i32
    return %c0_i32, %c0_i32_0 : i32, i32
  }
  func.func @transform_13(%arg0: i32) -> (i32, i32) {
    %c0_i32 = arith.constant 0 : i32
    %c0_i32_0 = arith.constant 0 : i32
    %c0_i32_1 = arith.constant 0 : i32
    return %c0_i32, %c0_i32_0 : i32, i32
  }
  func.func @transform_14(%arg0: i32) -> (i32, i32) {
    %c0_i32 = arith.constant 0 : i32
    %c0_i32_0 = arith.constant 0 : i32
    %c0_i32_1 = arith.constant 0 : i32
    return %c0_i32, %c0_i32_0 : i32, i32
  }
  func.func @transform_15(%arg0: i32) -> (i32, i32, i32) {
    %c0_i32 = arith.constant 0 : i32
    %c0_i32_0 = arith.constant 0 : i32
    %c0_i32_1 = arith.constant 0 : i32
    return %arg0, %c0_i32, %c0_i32_0 : i32, i32, i32
  }
  func.func @transform_16(%arg0: i32) -> (i32, i32, i32) {
    %c0_i32 = arith.constant 0 : i32
    %c0_i32_0 = arith.constant 0 : i32
    %c0_i32_1 = arith.constant 0 : i32
    return %arg0, %c0_i32, %c0_i32_0 : i32, i32, i32
  }
}

</mosaic_0001>

<bundles_post_ra>
// kernel: tpu_custom_call.1
= control target key start
LH: loop header
LB: loop body
LE: loop exit
PB: predicated region body
PF: predicated region fallthrough
CT: control target
= control target key end

     0   :  { %s2756_s0 = inlined_call_operand.vmem [shape: f32[2,16,4], index: 0, kind: input, shape index: {}]   ;;  %s2757_s1 = inlined_call_operand.hbm [shape: f32[3,4,8], index: 1, kind: input, shape index: {}]   ;;  %s2758_s2 = inlined_call_operand.vmem [shape: f32[1,8], index: 2, kind: input, shape index: {}]   ;;  %s2759_s3 = inlined_call_operand.vmem [shape: f32[3,8,8], index: 3, kind: input, shape index: {}]   ;;  %s2760_s4 = inlined_call_operand.vmem [shape: f32[1,8], index: 4, kind: input, shape index: {}]   ;;  %s2761_s5 = inlined_call_operand.hbm [shape: f32[4,8], index: 5, kind: input, shape index: {}]   ;;  %s2762_s6 = inlined_call_operand.vmem [shape: f32[1,8], index: 6, kind: input, shape index: {}]   ;;  %s2763_s7 = inlined_call_operand.vmem [shape: f32[3,8,8], index: 7, kind: input, shape index: {}]   ;;  %s2764_s8 = inlined_call_operand.vmem [shape: f32[1,8], index: 8, kind: input, shape index: {}]   ;;  %s2765_s9 = inlined_call_operand.vmem [shape: f32[3,8,8], index: 9, kind: input, shape index: {}]   ;;  %s2766_s10 = inlined_call_operand.vmem [shape: f32[1,8], index: 10, kind: input, shape index: {}]   ;;  %s2767_s11 = inlined_call_operand.vmem [shape: f32[8,4], index: 11, kind: input, shape index: {}]   ;;  %s2768_s12 = inlined_call_operand.vmem [shape: f32[1,4], index: 12, kind: input, shape index: {}]   ;;  %s2769_s13 = inlined_call_operand.vmem [shape: f32[8,4], index: 13, kind: input, shape index: {}]   ;;  %s2770_s14 = inlined_call_operand.vmem [shape: f32[1,4], index: 14, kind: input, shape index: {}]   ;;  %s2771_s15 = inlined_call_operand.vmem [shape: f32[2,16,4], index: 15, kind: output, shape index: {0}]   ;;  %s2772_s16 = inlined_call_operand.vmem [shape: f32[2,16,4], index: 16, kind: output, shape index: {1}]  }
   0x1   :  { %2776 = sst [smem:[#allocation9_spill]] %s2756_s0 }
   0x2   :  { %2777 = sst [smem:[#allocation10_spill]] %s2772_s16 }
   0x3   :  { %22 = vsyncpa [#allocation3], 0 }
   0x4   :  { %23 = vsyncpa [#allocation5], 0  ;;  %s2488_s21 = smov 0  }
   0x5 LB: > { %2778 = sst [smem:[#allocation8_spill]] %s2397_s21  ;;  %s2494_s22 = sadd.s32 4294967295, %s2397_s21   ;;  %s2397_s21 = sphi %s2488_s21, %s29_s21  }
   0x6   : > { %p2095_p0 = scmp.ge.s32.totalorder %s2397_s21, 1  ;;  %p406_p1 = scmp.lt.s32.totalorder %s2397_s21, 3 }
   0x7   : > { %s2399_s23 = smov [#allocation2]   ;;  %p2773_p3 = scmp.eq.s32.totalorder %s2494_s22, 0 }
   0x8   : > { %s418_s24 = sshll.u32 %s2399_s23, 4  ;;  %p2498_p2 = pnand %p2095_p0, %p406_p1  ;;  %s419_s24 = int_to_ptr.vmem [resolvable:$true] %s418_s24 }
   0x9   : > { %s2400_s26 = smov [#allocation4]   ;;  %s2327_s0 = scalar_lea.hbm %s2757_s1, 192 }
   0xa   : > { %s2779_s25 = scalar_select %p2498_p2, 1, 0 }
   0xb   : > { %p2304_p4 = pneg %p2498_p2  ;;  %s441_s27 = sshll.u32 %s2400_s26, 4  ;;  %s2511_s27 = int_to_ptr.vmem [resolvable:$true] %s441_s27 }
   0xc   : > { %p2328_p6 = scmp.ne.s32.totalorder %s2757_s1, %s2327_s0  ;;  %p2334_p10 = scmp.lt.u32.totalorder %s2327_s0, %s2757_s1 }
   0xd   : > { %p2507_p5 = pnand %p2773_p3, %p2304_p4 }
   0xf   : > { %p2329_p7 = pneg %p2507_p5 }
  0x11   : > { %p2330_p8 = pnand %p2329_p7, %p2328_p6 }
  0x13   : > { %p2331_p9 = pneg %p2330_p8 }
  0x15   : > { %p2336_p11 = pnand %p2334_p10, %p2331_p9 }
  0x17   : > { %2339 = shalt.err (!%p2336_p11)
}
  0x18   : > { %s2340_s23 = scalar_lea.vmem %s419_s24, 192  ;;  %p2348_p1 = scmp.lt.s32.totalorder %s419_s24, %s419_s24 }
  0x19   : > { %p2341_p12 = scmp.ne.s32.totalorder %s419_s24, %s2340_s23  ;;  %p2349_p4 = scmp.lt.s32.totalorder %s2340_s23, %s2340_s23 }
  0x1b   : > { %p2343_p13 = pnand %p2341_p12, %p2329_p7  ;;  %p2350_p3 = por %p2349_p4, %p2348_p1 }
  0x1d   : > { %p2344_p0 = pneg %p2343_p13 }
  0x1f   : > { %p2351_p2 = pnand %p2350_p3, %p2344_p0 }
  0x21   : > { %2354 = shalt.err (!%p2351_p2)
}
  0x22   : > { %s2401_s26 = smov 64   ;;  %s2402_s29 = smov 4  }
  0x23   : > { %2307 = dma.hbm_to_vmem [thread:$0]  (!%p2507_p5), %s2757_s1, 192, %s419_s24, [#allocation3], %s2401_s26, %s2401_s26, %s2402_s29  }
  0x24   : > { %s2355_s19 = scalar_lea.hbm %s2761_s5, 64 }
  0x25   : > { %p2356_p6 = scmp.ne.s32.totalorder %s2761_s5, %s2355_s19  ;;  %p2362_p8 = scmp.lt.u32.totalorder %s2355_s19, %s2761_s5 }
  0x27   : > { %p2358_p2 = pnand %p2356_p6, %p2329_p7 }
  0x29   : > { %p2359_p3 = pneg %p2358_p2 }
  0x2b   : > { %p2364_p9 = pnand %p2362_p8, %p2359_p3 }
  0x2d   : > { %2367 = shalt.err (!%p2364_p9)
}
  0x2e   : > { %s2368_s24 = scalar_lea.vmem %s2511_s27, 64  ;;  %p2376_p13 = scmp.lt.s32.totalorder %s2511_s27, %s2511_s27 }
  0x2f   : > { %p2369_p10 = scmp.ne.s32.totalorder %s2511_s27, %s2368_s24  ;;  %p2377_p0 = scmp.lt.s32.totalorder %s2368_s24, %s2368_s24 }
  0x31   : > { %p2371_p11 = pnand %p2369_p10, %p2329_p7  ;;  %p2378_p1 = por %p2377_p0, %p2376_p13 }
  0x33   : > { %p2372_p12 = pneg %p2371_p11 }
  0x35   : > { %p2379_p4 = pnand %p2378_p1, %p2372_p12 }
  0x37   : > { %2382 = shalt.err (!%p2379_p4)
}
  0x38   : > { %2310 = dma.hbm_to_vmem [thread:$0]  (!%p2507_p5), %s2761_s5, 64, %s2511_s27, [#allocation5]  }
  0x39   : > { %p2781_p6 = scmp.ne.s32.totalorder %s2779_s25, 0 }
  0x3a   : > { %p2782_p2 = scmp.eq.s32.totalorder (!%p2781_p6), %s2494_s22, 0 }
  0x3b   : > { %489 = sbr.rel (%p2781_p6) target bundleno = 1251 (0x4e3), region = 80 }
  0x42   : > { %2388 = dma.done.wait (%p2782_p2), [#allocation3], 192   ;;  %p2783_p7 = pmov %p2782_p2 }
  0x43   : > { %p2784_p3 = pmov %p2782_p2 }
  0x44   : > { %2390 = vsyncadd (%p2783_p7), [#allocation3], 4294967104 }
  0x45   : > { %2392 = dma.done.wait (%p2784_p3), [#allocation5], 64   ;;  %p2785_p8 = pmov %p2782_p2 }
  0x46   : > { %p548_p9 = scmp.lt.s32.totalorder %s2494_s22, 1  ;;  %v565_v0 = vlaneseq  ;;  %vm628_vm0 = vcmask 1043456   ;;  %s2786_s26 = sld [smem:[#allocation9_spill]]  ;;  %v620_v3 = vld [vmem:[#allocation2 + $0x4] sm:$0xf]  ;;  %vm621_vm5 = vcmask 31744  }
  0x47   : > { %2394 = vsyncadd (%p2785_p8), [#allocation5], 4294967232  ;;  %2205 = vmatprep.subr.msk.mxu0 %vm628_vm0, %v620_v3  ;;  %v605_v8 = vld [vmem:[#allocation2] sm:$0xf]  ;;  %v792_v16 = vld [vmem:[#allocation2 + $0x8] sm:$0xf] }
  0x48   : > { %s2790_s22 = smov (!%p548_p9, %s2494_s22), 1  ;;  %v2572_v1 = vshrl.u32 %v565_v0, 7  ;;  %2206 = vmatpush3.msk.msra.mxu0 %vm628_vm0, %v620_v3  ;;  %v2118_v18 = vld [vmem:[%s2759_s3 + $0x8] sm:$0xff]  ;;  %v896_v19 = vld [vmem:[%s2759_s3] sm:$0xff]  ;;  %vm905_vm6 = vcmask 64512   ;;  %v2123_v37 = vld [vmem:[%s2759_s3 + $0x10] sm:$0xff] }
  0x49   : > { %s2574_s25 = sshll.u32 %s2790_s22, 4  ;;  %2210 = vmatprep.subr.msk.mxu0 %vm628_vm0, %v605_v8  ;;  %2220 = vmatprep.subr.mxu1 %v2118_v18  ;;  %v1164_v20 = vld [vmem:[#allocation4] sm:$0xf]  ;;  %v2117_v21 = vld [vmem:[%s2758_s2] ss:$0 sm:$0xff]  ;;  %v2136_v63 = vld [vmem:[%s2763_s7 + $0x10] sm:$0xff] }
  0x4a   : > { %v2577_v2 = vand.u32 15, %v2572_v1  ;;  %vm610_vm1 = vcmp.lt.s32.totalorder %v2572_v1, 1  ;;  %vm596_vm2 = vcmp.lt.s32.totalorder %v2572_v1, 2  ;;  %2221 = vmatpush3.msra.mxu1 %v2118_v18  ;;  %v2131_v41 = vld [vmem:[%s2763_s7 + $0x8] sm:$0xff]  ;;  %v1265_v42 = vld [vmem:[%s2763_s7] sm:$0xff]  ;;  %vm1256_vm7 = vcmp.lt.s32.totalorder %v2572_v1, 4  ;;  %s557_s24 = scalar_lea.vmem %s2771_s15, %s2574_s25 }
  0x4b   : > { %2225 = vmatprep.subr.mxu1 %v896_v19  ;;  %v2126_v43 = vld [vmem:[%s2760_s4] ss:$0 sm:$0xff]  ;;  %s2787_s27 = sld [smem:[#allocation10_spill]] }
  0x4c   : > { %s552_s29 = scalar_lea.vmem %s2786_s26, %s2574_s25  ;;  %vm606_vm3 = vcmp.ge.s32.totalorder %v2577_v2, 1  ;;  %vm592_vm4 = vcmp.ge.s32.totalorder %v2577_v2, 2  ;;  %v2127_v44 = vld [vmem:[%s2762_s6] ss:$0 sm:$0xff]  ;;  %vm1252_vm8 = vcmp.ge.s32.totalorder %v2577_v2, 4 }
  0x4d   : > { %v563_v4 = vld [vmem:[%s552_s29] sm:$0xff]  ;;  %v564_v5 = vld [vmem:[%s552_s29 + $0x8] sm:$0xff] }
  0x4e   : > { %v608_v6 = vrot.slane %v563_v4, 7  ;;  %v609_v7 = vrot.slane %v564_v5, 7  ;;  %v594_v9 = vrot.slane %v563_v4, 6  ;;  %v595_v10 = vrot.slane %v564_v5, 6  ;;  %v1894_v1 = vld [vmem:[%s2769_s13] sm:$0xff] }
  0x4f   : > { %v1805_v2 = vld [vmem:[%s2767_s11] sm:$0xff] }
  0x50   : > { %v612_v11 = vsel %vm610_vm1, %v609_v7, %v608_v6  ;;  %v611_v12 = vsel %vm610_vm1, %v608_v6, %v609_v7  ;;  %v598_v13 = vsel %vm596_vm2, %v595_v10, %v594_v9  ;;  %v597_v17 = vsel %vm596_vm2, %v594_v9, %v595_v10  ;;  %v2139_v6 = vld [vmem:[%s2764_s8] ss:$0 sm:$0xff] }
  0x51   : > { %v617_v14 = vsel %vm606_vm3, %v612_v11, 0.0  ;;  %v603_v15 = vsel %vm592_vm4, %v598_v13, 0.0  ;;  %s562_s28 = scalar_lea.vmem %s2787_s27, %s2574_s25 }
  0x52   : > { %2207 = vmatprep.mubr.msk.f32.mxu0 %vm621_vm5, %v617_v14 }
  0x53   : > { %2208 = vmatmul.mubr.msk.f32.vlgmr.msra.gmra.mrb[0].mxu0 %vm621_vm5, %v611_v12 }
  0x54   : > { %2211 = vmatpush3.msk.msra.mxu0 %vm628_vm0, %v605_v8  ;;  %2212 = vmatprep.mubr.msk.f32.mxu0 %vm621_vm5, %v603_v15 }
  0x55   : > { %2215 = vmatprep.subr.msk.mxu0 %vm628_vm0, %v792_v16 }
  0x5b   : > { %2213 = vmatmul.mubr.msk.f32.vlgmr.msra.gmra.mrb[0].mxu0 %vm621_vm5, %v597_v17 }
  0x5c   : > { %2216 = vmatpush3.msk.msra.mxu0 %vm628_vm0, %v792_v16  ;;  %2217 = vmatprep.mubr.msk.f32.mxu0 %vm621_vm5, %v563_v4 }
  0x5d   : > { %2235 = vmatprep.subr.msk.mxu0 %vm628_vm0, %v1164_v20 }
  0x63   : > { %2218 = vmatmul.mubr.msk.f32.vlgmr.msra.gmra.mrb[0].mxu0 %vm621_vm5, %v564_v5 }
  0x64   : > { %2237 = vmatprep.mubr.msk.f32.mxu0 %vm621_vm5, %v563_v4  ;;  %2236 = vmatpush3.msk.msra.mxu0 %vm628_vm0, %v1164_v20  ;;  %v2140_v4 = vld [vmem:[%s2765_s9 + $0x8] sm:$0xff] }
  0x65   : > { %2255 = vmatprep.subr.mxu0 %v2140_v4 }
  0x67   : > { %2238 = vmatmul.mubr.msk.f32.vlgmr.msra.gmra.mrb[2].mxu0 %vm621_vm5, %v564_v5  ;;  %v1538_v5 = vld [vmem:[%s2765_s9] sm:$0xff] }
  0x68   : > { %2256 = vmatpush3.msra.mxu0 %v2140_v4 }
  0x69   : > { %2260 = vmatprep.subr.mxu0 %v1538_v5 }
 0x136   : > { %v2219_v22 = vpop.f32.mrb[0].mxu0 }
 0x137   : > { %v887_v23 = vadd.f32 %v2219_v22, %v2117_v21  ;;  %v868_v24 = vpop.f32.mrb[1].mxu0  ;;  %v2145_v22 = vld [vmem:[%s2765_s9 + $0x10] sm:$0xff] }
 0x138   : > { %v886_v25 = vadd.f32 %v2117_v21, %v868_v24  ;;  %v2148_v24 = vld [vmem:[%s2766_s10] ss:$0 sm:$0xff] }
 0x139   : > { %v889_v26 = vmax.f32 %v887_v23, 0.0 }
 0x13a   : > { %v888_v27 = vmax.f32 %v886_v25, 0.0  ;;  %v2239_v39 = vpop.f32.mrb[2].mxu0 }
 0x13b   : > { %v891_v28 = vrot.slane %v889_v26, 6  ;;  %v898_v29 = vrot.slane %v889_v26, 7  ;;  %v1241_v40 = vpop.f32.mrb[3].mxu0  ;;  %v1247_v48 = vadd.f32 %v2239_v39, %v2127_v44 }
 0x13c   : > { %v890_v30 = vrot.slane %v888_v27, 6  ;;  %v897_v31 = vrot.slane %v888_v27, 7  ;;  %v1242_v50 = vadd.f32 %v2127_v44, %v1241_v40 }
 0x13e   : > { %v900_v32 = vsel %vm610_vm1, %v898_v29, %v897_v31  ;;  %v899_v33 = vsel %vm610_vm1, %v897_v31, %v898_v29  ;;  %v893_v34 = vsel %vm596_vm2, %v891_v28, %v890_v30  ;;  %v892_v35 = vsel %vm596_vm2, %v890_v30, %v891_v28  ;;  %v2149_v31 = vld [vmem:[%s2768_s12] ss:$0 sm:$0xff] }
 0x13f   : > { %v901_v36 = vsel %vm606_vm3, %v900_v32, 0.0  ;;  %v894_v38 = vsel %vm592_vm4, %v893_v34, 0.0  ;;  %v2152_v32 = vld [vmem:[%s2770_s14] ss:$0 sm:$0xff] }
 0x140   : > { %2222 = vmatprep.mubr.msk.f32.mxu1 %vm905_vm6, %v901_v36 }
 0x141   : > { %2223 = vmatmul.mubr.msk.f32.vlgmr.msra.gmra.mrb[0].mxu1 %vm905_vm6, %v899_v33 }
 0x142   : > { %2226 = vmatpush3.msra.mxu1 %v896_v19  ;;  %2227 = vmatprep.mubr.msk.f32.mxu1 %vm905_vm6, %v894_v38 }
 0x143   : > { %2230 = vmatprep.subr.mxu1 %v2123_v37 }
 0x149   : > { %2228 = vmatmul.mubr.msk.f32.vlgmr.msra.gmra.mrb[0].mxu1 %vm905_vm6, %v892_v35 }
 0x14a   : > { %2231 = vmatpush3.msra.mxu1 %v2123_v37  ;;  %2232 = vmatprep.mubr.msk.f32.mxu1 %vm905_vm6, %v888_v27 }
 0x14b   : > { %2240 = vmatprep.subr.mxu1 %v2131_v41 }
 0x151   : > { %2233 = vmatmul.mubr.msk.f32.vlgmr.msra.gmra.mrb[0].mxu1 %vm905_vm6, %v889_v26 }
 0x152   : > { %2241 = vmatpush3.msra.mxu1 %v2131_v41 }
 0x153   : > { %2245 = vmatprep.subr.mxu1 %v1265_v42 }
 0x224   : > { %v2234_v45 = vpop.f32.mrb[0].mxu1 }
 0x225   : > { %v1161_v46 = vadd.f32 %v2234_v45, %v2126_v43  ;;  %v1142_v47 = vpop.f32.mrb[1].mxu1 }
 0x226   : > { %v1160_v49 = vadd.f32 %v2126_v43, %v1142_v47 }
 0x227   : > { %v1163_v51 = vmax.f32 %v1161_v46, 0.0 }
 0x228   : > { %v1162_v52 = vmax.f32 %v1160_v49, 0.0 }
 0x229   : > { %v2657_v53 = vadd.f32 %v1247_v48, %v1163_v51 }
 0x22a   : > { %v2659_v54 = vadd.f32 %v1242_v50, %v1162_v52 }
 0x22b   : > { %v1267_v55 = vrot.slane %v2657_v53, 6  ;;  %v1255_v56 = vrot.slane %v2657_v53, 4 }
 0x22c   : > { %v1266_v57 = vrot.slane %v2659_v54, 6  ;;  %v1254_v58 = vrot.slane %v2659_v54, 4 }
 0x22e   : > { %v1269_v59 = vsel %vm596_vm2, %v1267_v55, %v1266_v57  ;;  %v1258_v60 = vsel %vm1256_vm7, %v1255_v56, %v1254_v58  ;;  %v1268_v62 = vsel %vm596_vm2, %v1266_v57, %v1267_v55  ;;  %v1257_v3 = vsel %vm1256_vm7, %v1254_v58, %v1255_v56 }
 0x22f   : > { %v1270_v61 = vsel %vm592_vm4, %v1269_v59, 0.0  ;;  %v1263_v0 = vsel %vm1252_vm8, %v1258_v60, 0.0 }
 0x230   : > { %2242 = vmatprep.mubr.msk.f32.mxu1 %vm905_vm6, %v1270_v61 }
 0x231   : > { %2243 = vmatmul.mubr.msk.f32.vlgmr.msra.gmra.mrb[2].mxu1 %vm905_vm6, %v1268_v62 }
 0x232   : > { %2246 = vmatpush3.msra.mxu1 %v1265_v42  ;;  %2247 = vmatprep.mubr.msk.f32.mxu1 %vm905_vm6, %v1263_v0 }
 0x233   : > { %2250 = vmatprep.subr.mxu1 %v2136_v63 }
 0x239   : > { %2248 = vmatmul.mubr.msk.f32.vlgmr.msra.gmra.mrb[2].mxu1 %vm905_vm6, %v1257_v3 }
 0x23a   : > { %2251 = vmatpush3.msra.mxu1 %v2136_v63  ;;  %2252 = vmatprep.mubr.msk.f32.mxu1 %vm905_vm6, %v2659_v54 }
 0x23b   : > { %2270 = vmatprep.subr.mxu1 %v1805_v2 }
 0x241   : > { %2253 = vmatmul.mubr.msk.f32.vlgmr.msra.gmra.mrb[2].mxu1 %vm905_vm6, %v2657_v53 }
 0x242   : > { %2271 = vmatpush3.msra.mxu1 %v1805_v2 }
 0x314   : > { %v2254_v7 = vpop.f32.mrb[2].mxu1 }
 0x315   : > { %v1529_v8 = vadd.f32 %v2254_v7, %v2139_v6  ;;  %v1510_v9 = vpop.f32.mrb[3].mxu1 }
 0x316   : > { %v1528_v10 = vadd.f32 %v2139_v6, %v1510_v9 }
 0x317   : > { %v1531_v11 = vmax.f32 %v1529_v8, 0.0 }
 0x318   : > { %v1530_v12 = vmax.f32 %v1528_v10, 0.0 }
 0x319   : > { %v1533_v13 = vrot.slane %v1531_v11, 4  ;;  %v1540_v14 = vrot.slane %v1531_v11, 6 }
 0x31a   : > { %v1532_v15 = vrot.slane %v1530_v12, 4  ;;  %v1539_v16 = vrot.slane %v1530_v12, 6 }
 0x31c   : > { %v1542_v17 = vsel %vm596_vm2, %v1540_v14, %v1539_v16  ;;  %v1541_v18 = vsel %vm596_vm2, %v1539_v16, %v1540_v14  ;;  %v1535_v19 = vsel %vm1256_vm7, %v1533_v13, %v1532_v15  ;;  %v1534_v20 = vsel %vm1256_vm7, %v1532_v15, %v1533_v13 }
 0x31d   : > { %v1543_v21 = vsel %vm592_vm4, %v1542_v17, 0.0  ;;  %v1536_v23 = vsel %vm1252_vm8, %v1535_v19, 0.0 }
 0x31e   : > { %2257 = vmatprep.mubr.msk.f32.mxu0 %vm905_vm6, %v1543_v21 }
 0x31f   : > { %2258 = vmatmul.mubr.msk.f32.vlgmr.msra.gmra.mrb[4].mxu0 %vm905_vm6, %v1541_v18 }
 0x320   : > { %2261 = vmatpush3.msra.mxu0 %v1538_v5  ;;  %2262 = vmatprep.mubr.msk.f32.mxu0 %vm905_vm6, %v1536_v23 }
 0x321   : > { %2265 = vmatprep.subr.mxu0 %v2145_v22 }
 0x327   : > { %2263 = vmatmul.mubr.msk.f32.vlgmr.msra.gmra.mrb[4].mxu0 %vm905_vm6, %v1534_v20 }
 0x328   : > { %2266 = vmatpush3.msra.mxu0 %v2145_v22  ;;  %2267 = vmatprep.mubr.msk.f32.mxu0 %vm905_vm6, %v1530_v12 }
 0x329   : > { %2275 = vmatprep.subr.mxu0 %v1894_v1 }
 0x32f   : > { %2268 = vmatmul.mubr.msk.f32.vlgmr.msra.gmra.mrb[4].mxu0 %vm905_vm6, %v1531_v11 }
 0x330   : > { %2276 = vmatpush3.msra.mxu0 %v1894_v1 }
 0x402   : > { %v2269_v25 = vpop.f32.mrb[4].mxu0 }
 0x403   : > { %v1802_v26 = vadd.f32 %v2269_v25, %v2148_v24  ;;  %v1783_v27 = vpop.f32.mrb[5].mxu0 }
 0x404   : > { %v1801_v28 = vadd.f32 %v2148_v24, %v1783_v27 }
 0x405   : > { %v1804_v30 = vadd.f32 %v1802_v26, %v2657_v53 }
 0x406   : > { %v1803_v29 = vadd.f32 %v1801_v28, %v2659_v54 }
 0x408   : > { %2272 = vmatprep.mubr.msk.f32.mxu1 %vm905_vm6, %v1803_v29  ;;  %2277 = vmatprep.mubr.msk.f32.mxu0 %vm905_vm6, %v1803_v29 }
 0x409   : > { %2273 = vmatmul.mubr.msk.f32.vlgmr.msra.gmra.mrb[4].mxu1 %vm905_vm6, %v1804_v30  ;;  %2278 = vmatmul.mubr.msk.f32.vlgmr.msra.gmra.mrb[6].mxu0 %vm905_vm6, %v1804_v30 }
 0x4dc   : > { %v2274_v33 = vpop.f32.mrb[4].mxu1  ;;  %v2279_v34 = vpop.f32.mrb[6].mxu0 }
 0x4dd   : > { %v1891_v35 = vadd.f32 %v2274_v33, %v2149_v31  ;;  %v1974_v36 = vadd.f32 %v2279_v34, %v2152_v32  ;;  %v1885_v37 = vpop.f32.mrb[5].mxu1  ;;  %v1968_v38 = vpop.f32.mrb[7].mxu0 }
 0x4de   : > { %v1886_v39 = vadd.f32 %v2149_v31, %v1885_v37  ;;  %v1969_v40 = vadd.f32 %v2152_v32, %v1968_v38 }
 0x4df   : > { %1978 = vst.msk [vmem:[%s557_s24 + $0x8] sm:$0xff] %vm621_vm5, %v1891_v35  ;;  %v1980_v41 = vmax.f32 %v1974_v36, 0.0 }
 0x4e0   : > { %1977 = vst.msk [vmem:[%s557_s24] sm:$0xff] %vm621_vm5, %v1886_v39  ;;  %v1979_v42 = vmax.f32 %v1969_v40, 0.0 }
 0x4e1   : > { %1982 = vst.msk [vmem:[%s562_s28 + $0x8] sm:$0xff] %vm621_vm5, %v1980_v41 }
 0x4e2   : > { %1981 = vst.msk [vmem:[%s562_s28] sm:$0xff] %vm621_vm5, %v1979_v42 }
 0x4e3 PF: > { %s2788_s26 = sld [smem:[#allocation8_spill]] }
 0x4e9   : > { %s29_s21 = sadd.s32 1, %s2788_s26  }
 0x4ea   : > { %p26_p5 = scmp.ge.s32.totalorder %s29_s21, 4  }
 0x4ec   :  { %28 = sbr.rel (!%p26_p5) target bundleno = 5 (0x5), region = 139 }
 0x4f3   :  { %2020 = vsyncpa [#allocation3], 1 }
 0x4f4   :  { %2022 = vsyncpa [#allocation3 + $0x1], 1 }
 0x4f5   :  { %2023 = vsyncpa [#allocation5], 1 }

</bundles_post_ra>
